<compile_context>
chip_gen: v7x
topology: tpu7x:2x2x1
jax: 0.10.0
libtpu: 0.0.40
codegen_flags: <defaults>
</compile_context>

<pallas_src>
import functools

import jax
import jax.numpy as jnp
from jax.experimental import pallas as pl
from jax.experimental.pallas import tpu as pltpu

_SOFTMAX_SCALE = 10.0   # CrossScaleAttention.softmax_scale
_ESCAPE_NAN = 1e-4      # CrossScaleAttention.escape_NaN


def _pick_tile(m, cap=512):
    """Full dim when small (no ragged block), else a 512-row tile."""
    return m if m <= cap else cap


def _pick_qtile(hw, cap=256):
    return hw if hw <= cap else cap


# --------------------------------------------------------------------------
# Pallas kernels
# --------------------------------------------------------------------------
def _mm_bias_prelu_kernel(a_ref, b_ref, bias_ref, slope_ref, o_ref):
    # out = prelu(A @ B + bias, per-column slope); bf16 MXU inputs, f32 accumulate.
    acc = jnp.dot(a_ref[...].astype(jnp.bfloat16), b_ref[...],
                  preferred_element_type=jnp.float32)
    acc = acc + bias_ref[...]
    o_ref[...] = jnp.where(acc >= 0.0, acc, slope_ref[...] * acc).astype(o_ref.dtype)


def _mm_kernel(a_ref, b_ref, o_ref):
    # Epilogue-free GEMM (transposed-conv column matrices).
    o_ref[...] = jnp.dot(a_ref[...].astype(jnp.bfloat16), b_ref[...],
                         preferred_element_type=jnp.float32)


def _nla_deconv_kernel(e1_ref, e2_ref, asm_ref, wd_ref, o_ref):
    # Fused NonLocalAttention + ConvTranspose GEMM (query-tiled, keys whole):
    #   score = softmax(E1 @ E2^T); ctx = score @ A; cols = ctx @ Wdeconv
    q = e1_ref[0].astype(jnp.bfloat16)                        # (tq, Cr)
    k = e2_ref[0].astype(jnp.bfloat16)                        # (HW, Cr)
    s = jax.lax.dot_general(q, k, (((1,), (1,)), ((), ())),
                            preferred_element_type=jnp.float32)      # (tq, HW)
    m = jnp.max(s, axis=-1, keepdims=True)
    e = jnp.exp(s - m)
    inv = pl.reciprocal(jnp.sum(e, axis=-1, keepdims=True), approx=True)
    p = (e * inv).astype(jnp.bfloat16)
    ctx = jnp.dot(p, asm_ref[0].astype(jnp.bfloat16),
                  preferred_element_type=jnp.float32)                # (tq, C)
    o_ref[0] = jnp.dot(ctx.astype(jnp.bfloat16), wd_ref[...],
                       preferred_element_type=jnp.float32)           # (tq, kh*kw*C)


def _csa_kernel(p_ref, w_ref, r_ref, o_ref, wn_ref):
    # Query-tiled CrossScaleAttention core:
    #   wn  = w / max(||w_patch||_2, 1e-4)  (computed once per batch element)
    #   s   = softmax(10 * (P @ wn^T), axis=-1)
    #   out = (s @ R) * (1/6)               (deconv-as-matmul; fold outside)
    @pl.when(pl.program_id(1) == 0)
    def _():
        w = w_ref[0].astype(jnp.float32)                      # (L, Crk)
        ssq = jnp.sum(w * w, axis=1, keepdims=True)
        wn_ref[...] = (w * jax.lax.rsqrt(
            jnp.maximum(ssq, _ESCAPE_NAN * _ESCAPE_NAN))).astype(jnp.bfloat16)

    p = p_ref[0].astype(jnp.bfloat16)                         # (tq, Crk)
    s = jax.lax.dot_general(p, wn_ref[...], (((1,), (1,)), ((), ())),
                            preferred_element_type=jnp.float32) * _SOFTMAX_SCALE
    m = jnp.max(s, axis=-1, keepdims=True)
    e = jnp.exp(s - m)
    inv = pl.reciprocal(jnp.sum(e, axis=-1, keepdims=True), approx=True)
    prob = (e * inv).astype(jnp.bfloat16)
    acc = jnp.dot(prob, r_ref[0].astype(jnp.bfloat16),
                  preferred_element_type=jnp.float32)
    o_ref[0] = acc * (1.0 / 6.0)


# --------------------------------------------------------------------------
# Pallas wrappers
# --------------------------------------------------------------------------
@functools.partial(jax.jit, static_argnames=("out_dtype",))
def pallas_matmul_bias_prelu(a, b, bias, slope_vec, out_dtype=jnp.float32):
    """prelu(a @ b + bias, slope).  a:(M,K) f32/bf16, b:(K,N), bias:(N,), slope:(N,)."""
    M, K = a.shape
    N = b.shape[1]
    tm = _pick_tile(M)
    return pl.pallas_call(
        _mm_bias_prelu_kernel,
        out_shape=jax.ShapeDtypeStruct((M, N), out_dtype),
        grid=(pl.cdiv(M, tm),),
        in_specs=[
            pl.BlockSpec((tm, K), lambda i: (i, 0)),
            pl.BlockSpec((K, N), lambda i: (0, 0)),
            pl.BlockSpec((1, N), lambda i: (0, 0)),
            pl.BlockSpec((1, N), lambda i: (0, 0)),
        ],
        out_specs=pl.BlockSpec((tm, N), lambda i: (i, 0)),
        compiler_params=pltpu.CompilerParams(dimension_semantics=("parallel",)),
    )(a, b.astype(jnp.bfloat16),
      bias.reshape(1, N).astype(jnp.float32),
      slope_vec.reshape(1, N).astype(jnp.float32))


@jax.jit
def pallas_matmul(a, b):
    """a @ b with bf16 MXU inputs / f32 accumulation (no epilogue)."""
    M, K = a.shape
    N = b.shape[1]
    tm = _pick_tile(M)
    return pl.pallas_call(
        _mm_kernel,
        out_shape=jax.ShapeDtypeStruct((M, N), jnp.float32),
        grid=(pl.cdiv(M, tm),),
        in_specs=[
            pl.BlockSpec((tm, K), lambda i: (i, 0)),
            pl.BlockSpec((K, N), lambda i: (0, 0)),
        ],
        out_specs=pl.BlockSpec((tm, N), lambda i: (i, 0)),
        compiler_params=pltpu.CompilerParams(dimension_semantics=("parallel",)),
    )(a, b.astype(jnp.bfloat16))


@jax.jit
def pallas_non_local_deconv(e1, e2, asm, wd):
    """Fused NLA + deconv GEMM.
    e1/e2:(N,HW,Cr), asm:(N,HW,C) bf16, wd:(C,kh*kw*C) -> cols (N,HW,kh*kw*C) f32."""
    N, HW, Cr = e1.shape
    C = asm.shape[2]
    KKO = wd.shape[1]
    tq = _pick_qtile(HW)
    return pl.pallas_call(
        _nla_deconv_kernel,
        out_shape=jax.ShapeDtypeStruct((N, HW, KKO), jnp.float32),
        grid=(N, pl.cdiv(HW, tq)),
        in_specs=[
            pl.BlockSpec((1, tq, Cr), lambda n, q: (n, q, 0)),
            pl.BlockSpec((1, HW, Cr), lambda n, q: (n, 0, 0)),
            pl.BlockSpec((1, HW, C), lambda n, q: (n, 0, 0)),
            pl.BlockSpec((C, KKO), lambda n, q: (0, 0)),
        ],
        out_specs=pl.BlockSpec((1, tq, KKO), lambda n, q: (n, q, 0)),
        compiler_params=pltpu.CompilerParams(
            dimension_semantics=("parallel", "parallel")),
    )(e1, e2, asm, wd.astype(jnp.bfloat16))


@jax.jit
def pallas_cross_scale(patches, w, raw):
    # patches: (N, HW, Crk), w: (N, L, Crk), raw: (N, L, CK2) -> (N, HW, CK2)
    N, HW, Crk = patches.shape
    L = w.shape[1]
    CK2 = raw.shape[2]
    tq = _pick_qtile(HW)
    return pl.pallas_call(
        _csa_kernel,
        out_shape=jax.ShapeDtypeStruct((N, HW, CK2), jnp.float32),
        grid=(N, pl.cdiv(HW, tq)),
        in_specs=[
            pl.BlockSpec((1, tq, Crk), lambda n, q: (n, q, 0)),
            pl.BlockSpec((1, L, Crk), lambda n, q: (n, 0, 0)),
            pl.BlockSpec((1, L, CK2), lambda n, q: (n, 0, 0)),
        ],
        out_specs=pl.BlockSpec((1, tq, CK2), lambda n, q: (n, q, 0)),
        scratch_shapes=[pltpu.VMEM((L, Crk), jnp.bfloat16)],
        compiler_params=pltpu.CompilerParams(
            dimension_semantics=("parallel", "arbitrary")),
    )(patches, w, raw)


# --------------------------------------------------------------------------
# Plain-JAX glue (NHWC): im2col / col2im / padding / bilinear resize / prelu
# --------------------------------------------------------------------------
def prelu(x, slope):
    return jnp.where(x >= 0, x, slope * x)


def unfold_nhwc(x, kh, kw, sh, sw):
    """(N,H,W,C) -> (N, L, kh*kw*C) with per-position layout (kh, kw, C)."""
    N, H, W, C = x.shape
    nh = (H - kh) // sh + 1
    nw = (W - kw) // sw + 1
    cols = []
    for i in range(kh):
        for j in range(kw):
            cols.append(x[:, i:i + sh * nh:sh, j:j + sw * nw:sw, :])
    cols = jnp.stack(cols, axis=3)                  # (N, nh, nw, kh*kw, C)
    return cols.reshape(N, nh * nw, kh * kw * C), nh, nw


def fold_nhwc(cols, out_h, out_w, kh, kw, stride, padding):
    """col2im (sum of overlaps): cols (N, L, kh*kw*C), layout (kh, kw, C)."""
    N, L, KKC = cols.shape
    C = KKC // (kh * kw)
    ph, pw = out_h + 2 * padding, out_w + 2 * padding
    nh = (ph - kh) // stride + 1
    nw = (pw - kw) // stride + 1
    cols = cols.reshape(N, nh, nw, kh, kw, C)
    out = jnp.zeros((N, ph, pw, C), cols.dtype)
    for i in range(kh):
        for j in range(kw):
            out = out.at[:, i:i + stride * nh:stride,
                         j:j + stride * nw:stride, :].add(cols[:, :, :, i, j, :])
    return out[:, padding:padding + out_h, padding:padding + out_w, :]


def same_pad_amounts(H, W, kh, kw, sh, sw):
    out_rows = (H + sh - 1) // sh
    out_cols = (W + sw - 1) // sw
    pad_rows = max(0, (out_rows - 1) * sh + kh - H)
    pad_cols = max(0, (out_cols - 1) * sw + kw - W)
    top = pad_rows // 2
    left = pad_cols // 2
    return top, pad_rows - top, left, pad_cols - left


def bilinear_resize_nhwc(x, out_h, out_w):
    """F.interpolate(..., mode='bilinear', align_corners=False) on NHWC."""
    _, in_h, in_w, _ = x.shape

    def coords(out, inn):
        i = jnp.arange(out, dtype=jnp.float32)
        src = (i + 0.5) * (inn / out) - 0.5
        src = jnp.maximum(src, 0.0)
        i0 = jnp.minimum(jnp.floor(src).astype(jnp.int32), inn - 1)
        i1 = jnp.minimum(i0 + 1, inn - 1)
        frac = src - i0.astype(jnp.float32)
        return i0, i1, frac

    r0, r1, fr = coords(out_h, in_h)
    c0, c1, fc = coords(out_w, in_w)
    top = x[:, r0, :, :]
    bot = x[:, r1, :, :]
    rows = top * (1.0 - fr)[None, :, None, None] + bot * fr[None, :, None, None]
    left = rows[:, :, c0, :]
    right = rows[:, :, c1, :]
    return left * (1.0 - fc)[None, None, :, None] + right * fc[None, None, :, None]


# --------------------------------------------------------------------------
# Conv / ConvTranspose via im2col + Pallas GEMM (NHWC, transpose-free)
# --------------------------------------------------------------------------
def _slope_vec(slope, n):
    return jnp.broadcast_to(jnp.reshape(jnp.asarray(slope, jnp.float32), (-1,)), (n,))


@functools.partial(jax.jit, static_argnames=("stride", "padding"))
def conv2d(x, w, b, slope, *, stride=1, padding=0):
    """nn.Conv2d + bias + single-parameter PReLU.  x NHWC, w torch (O,I,kh,kw)."""
    N, H, W, C = x.shape
    O, I, kh, kw = w.shape
    if kh == 1 and kw == 1 and stride == 1 and padding == 0:
        A = x.reshape(N * H * W, C)
        B = w.reshape(O, C).T
        out = pallas_matmul_bias_prelu(A, B, b, _slope_vec(slope, O))
        return out.reshape(N, H, W, O)
    xb = x.astype(jnp.bfloat16)                    # im2col buffer materialised in bf16
    if padding:
        xb = jnp.pad(xb, ((0, 0), (padding, padding), (padding, padding), (0, 0)))
    cols, nh, nw = unfold_nhwc(xb, kh, kw, stride, stride)      # (N, L, kh*kw*I)
    A = cols.reshape(N * nh * nw, kh * kw * I)
    B = w.transpose(2, 3, 1, 0).reshape(kh * kw * I, O)         # (kh,kw,I) x O
    out = pallas_matmul_bias_prelu(A, B, b, _slope_vec(slope, O))
    return out.reshape(N, nh, nw, O)


def conv1x1_fused(x, ws, bs, slopes, out_dtype=jnp.float32):
    """Several 1x1 convs sharing input x fused into one lane-dense Pallas GEMM."""
    N, H, W, C = x.shape
    A = x.reshape(N * H * W, C)
    B = jnp.concatenate([w.reshape(w.shape[0], C).T for w in ws], axis=1)
    bias = jnp.concatenate(list(bs), axis=0)
    slope = jnp.concatenate([_slope_vec(s, w.shape[0]) for s, w in zip(slopes, ws)],
                            axis=0)
    out = pallas_matmul_bias_prelu(A, B, bias, slope, out_dtype=out_dtype)
    outs, off = [], 0
    for w in ws:
        Oi = w.shape[0]
        outs.append(out[:, off:off + Oi].reshape(N, H, W, Oi))
        off += Oi
    return outs


def _deconv_finish(cols, H, W, kh, kw, O, b, slope, stride, padding):
    """col2im + bias + PReLU tail shared by conv_transpose2d and the fused NLA path."""
    out_h = (H - 1) * stride - 2 * padding + kh
    out_w = (W - 1) * stride - 2 * padding + kw
    out = fold_nhwc(cols, out_h, out_w, kh, kw, stride, padding)
    out = out + b.reshape(1, 1, 1, O)
    return prelu(out, slope)


@functools.partial(jax.jit, static_argnames=("stride", "padding"))
def conv_transpose2d(x, w, b, slope, *, stride, padding):
    """nn.ConvTranspose2d + bias + PReLU.  x NHWC, w torch (I,O,kh,kw)."""
    N, H, W, I = x.shape
    _, O, kh, kw = w.shape
    A = x.reshape(N * H * W, I)
    B = w.transpose(0, 2, 3, 1).reshape(I, kh * kw * O)         # cols layout (kh,kw,O)
    cols = pallas_matmul(A, B).reshape(N, H * W, kh * kw * O)
    return _deconv_finish(cols, H, W, kh, kw, O, b, slope, stride, padding)


# --------------------------------------------------------------------------
# Module forwards (functional, NHWC internally)
# --------------------------------------------------------------------------
_ONE = jnp.ones((), jnp.float32)


def non_local_attention_upsample(x, nla_p, up_p):
    """NonLocalAttention followed by the 6x6/stride-2 ConvTranspose (fused GEMMs)."""
    N, H, W, C = x.shape
    e1, e2, asm = conv1x1_fused(
        x,
        [nla_p['m1']['w'], nla_p['m2']['w'], nla_p['asm']['w']],
        [nla_p['m1']['b'], nla_p['m2']['b'], nla_p['asm']['b']],
        [nla_p['m1']['s'], nla_p['m2']['s'], nla_p['asm']['s']],
        out_dtype=jnp.bfloat16)
    Cr = e1.shape[-1]
    I, O, kh, kw = up_p['w'].shape
    Bd = up_p['w'].transpose(0, 2, 3, 1).reshape(I, kh * kw * O)
    cols = pallas_non_local_deconv(e1.reshape(N, H * W, Cr),
                                   e2.reshape(N, H * W, Cr),
                                   asm.reshape(N, H * W, C),
                                   Bd)                           # (N, HW, kh*kw*O)
    return _deconv_finish(cols, H, W, kh, kw, O, up_p['b'], up_p['s'],
                          stride=2, padding=2)


def cross_scale_attention(x, p, *, scale=2, ksize=3, stride=1):
    N, H, W, C = x.shape
    embed_w, match_input = conv1x1_fused(
        x,
        [p['asm']['w'], p['m1']['w']],
        [p['asm']['b'], p['m1']['b']],
        [p['asm']['s'], p['m1']['s']],
        out_dtype=jnp.bfloat16)
    kernel = scale * ksize

    # raw deconv kernels from embed_w ('same' padding, stride scale*stride)
    t, bo, l, r = same_pad_amounts(H, W, kernel, kernel, scale * stride, scale * stride)
    ew = jnp.pad(embed_w, ((0, 0), (t, bo), (l, r), (0, 0)))
    R, _, _ = unfold_nhwc(ew, kernel, kernel, scale * stride, scale * stride)

    # matching kernels from bilinearly down-scaled reference
    ref = bilinear_resize_nhwc(x, H // scale, W // scale)
    ref = conv2d(ref, p['m2']['w'], p['m2']['b'], p['m2']['s'], stride=1, padding=0)
    _, hr, wr, _ = ref.shape
    t2, b2, l2, r2 = same_pad_amounts(hr, wr, ksize, ksize, stride, stride)
    refp = jnp.pad(ref, ((0, 0), (t2, b2), (l2, r2), (0, 0))).astype(jnp.bfloat16)
    Wc, _, _ = unfold_nhwc(refp, ksize, ksize, stride, stride)   # (N, L, Cr*9)

    # query patches of match_input ('same' padding, stride 1)
    t3, b3, l3, r3 = same_pad_amounts(H, W, ksize, ksize, 1, 1)
    xp = jnp.pad(match_input, ((0, 0), (t3, b3), (l3, r3), (0, 0)))
    P, _, _ = unfold_nhwc(xp, ksize, ksize, 1, 1)                # (N, HW, Cr*9)

    cols_out = pallas_cross_scale(P, Wc, R)                      # (N, HW, C*K*K)
    out_h = (H - 1) * (scale * stride) - 2 * scale + kernel
    out_w = (W - 1) * (scale * stride) - 2 * scale + kernel
    return fold_nhwc(cols_out, out_h, out_w, kernel, kernel, scale * stride, scale)


def multisource_projection(x, p):
    down_map = non_local_attention_upsample(x, p['nla'], p['up'])
    up_map = cross_scale_attention(x, p['csa'], scale=2)
    t = up_map - down_map
    r = conv2d(t, p['enc']['c1_w'], p['enc']['c1_b'], p['enc']['s'], stride=1, padding=1)
    r = conv2d(r, p['enc']['c2_w'], p['enc']['c2_b'], _ONE, stride=1, padding=1)
    err = t + r                                                  # ResBlock, res_scale=1
    return down_map + err


def recurrent_projection(x, p):
    """RecurrentProjection with scale=4."""
    x_up = multisource_projection(x, p['msp1'])
    x_down = conv2d(x_up, p['ds1']['w'], p['ds1']['b'], p['ds1']['s'], stride=2, padding=2)
    error_up = conv_transpose2d(x - x_down, p['ee']['w'], p['ee']['b'], p['ee']['s'],
                                stride=2, padding=2)
    h = x_up + error_up
    x_up2 = multisource_projection(h, p['msp2'])
    x_down2 = conv2d(x_up2, p['ds3']['w'], p['ds3']['b'], p['ds3']['s'], stride=4, padding=2)
    error_up2 = conv_transpose2d(x - x_down2, p['ee2']['w'], p['ee2']['b'], p['ee2']['s'],
                                 stride=4, padding=2)
    h = x_up2 + error_up2
    x_final = conv2d(h, p['ds4']['w'], p['ds4']['b'], p['ds4']['s'], stride=4, padding=2)
    x_final = conv2d(x_final, p['post']['w'], p['post']['b'], p['post']['s'],
                     stride=1, padding=1)
    return x_final, h


_RGB_MEAN = jnp.array([0.4488, 0.4371, 0.404], jnp.float32)


@functools.partial(jax.jit, static_argnames=("depth",))
def csnln_forward(inp, params, depth, rgb_range=255.0):
    """inp is NCHW (PyTorch layout); internal compute is NHWC; output is NCHW."""
    mean = (_RGB_MEAN * rgb_range).reshape(1, 3, 1, 1)
    x = (inp - mean).transpose(0, 2, 3, 1)                       # sub_mean, -> NHWC
    x = conv2d(x, params['head1']['w'], params['head1']['b'], params['head1']['s'],
               stride=1, padding=1)
    x = conv2d(x, params['head2']['w'], params['head2']['b'], params['head2']['s'],
               stride=1, padding=1)
    bag = []
    for _ in range(depth):
        x, h = recurrent_projection(x, params['sem'])            # SEM weights shared
        bag.append(h)
    hf = jnp.concatenate(bag, axis=3)
    out = conv2d(hf, params['tail']['w'], params['tail']['b'], _ONE, stride=1, padding=1)
    return out.transpose(0, 3, 1, 2) + mean                      # -> NCHW, add_mean


# --------------------------------------------------------------------------
# Deterministic synthetic parameter initialization (torch-style weight layouts)
# --------------------------------------------------------------------------
def _conv_init(key, out_c, in_c, k):
    kw, kb = jax.random.split(key)
    return {'w': jax.random.normal(kw, (out_c, in_c, k, k), jnp.float32) * 0.05,
            'b': jax.random.normal(kb, (out_c,), jnp.float32) * 0.01,
            's': jnp.array(0.25, jnp.float32)}


def _deconv_init(key, in_c, out_c, k):
    kw, kb = jax.random.split(key)
    return {'w': jax.random.normal(kw, (in_c, out_c, k, k), jnp.float32) * 0.05,
            'b': jax.random.normal(kb, (out_c,), jnp.float32) * 0.01,
            's': jnp.array(0.25, jnp.float32)}


def _attn_init(key, C, Cr):
    k1, k2, k3 = jax.random.split(key, 3)
    return {'m1': _conv_init(k1, Cr, C, 1),
            'm2': _conv_init(k2, Cr, C, 1),
            'asm': _conv_init(k3, C, C, 1)}


def _msp_init(key, C):
    k1, k2, k3, k4, k5 = jax.random.split(key, 5)
    e1 = _conv_init(k4, C, C, 3)
    e2 = _conv_init(k5, C, C, 3)
    return {'csa': _attn_init(k1, C, C // 2),
            'nla': _attn_init(k2, C, C // 2),
            'up': _deconv_init(k3, C, C, 6),
            'enc': {'c1_w': e1['w'], 'c1_b': e1['b'], 's': jnp.array(0.25, jnp.float32),
                    'c2_w': e2['w'], 'c2_b': e2['b']}}


def _sem_init(key, C):
    ks = jax.random.split(key, 8)
    return {'msp1': _msp_init(ks[0], C),
            'msp2': _msp_init(ks[1], C),
            'ds1': _conv_init(ks[2], C, C, 6),
            'ee': _deconv_init(ks[3], C, C, 6),
            'ds3': _conv_init(ks[4], C, C, 8),
            'ds4': _conv_init(ks[5], C, C, 8),
            'ee2': _deconv_init(ks[6], C, C, 8),
            'post': _conv_init(ks[7], C, C, 3)}


def init_params(key, n_colors=3, n_feats=16, depth=2):
    ks = jax.random.split(key, 4)
    return {'head1': _conv_init(ks[0], n_feats, n_colors, 3),
            'head2': _conv_init(ks[1], n_feats, n_feats, 3),
            'sem': _sem_init(ks[2], n_feats),
            'tail': _conv_init(ks[3], n_colors, n_feats * depth, 3)}


# --------------------------------------------------------------------------
if __name__ == "__main__":
    key = jax.random.PRNGKey(0)
    kp, kx = jax.random.split(key)

    depth = 2          # small depth for the synthetic test (module default is 12)
    n_feats = 16       # small n_feats (module default is 64); scale=4 semantics kept
    batch, n_colors, H, W = 2, 3, 8, 8

    params = init_params(kp, n_colors=n_colors, n_feats=n_feats, depth=depth)
    x = jax.random.uniform(kx, (batch, n_colors, H, W), jnp.float32) * 255.0

    out = csnln_forward(x, params, depth=depth)
    out = jax.block_until_ready(out)

    assert out.shape == (batch, n_colors, 4 * H, 4 * W), out.shape
    assert bool(jnp.all(jnp.isfinite(out)))
    print("KERNEL_OK")
</pallas_src>

<mosaic_0001>
module attributes {stable_mosaic.version = 11 : i64} {
  func.func @_mm_bias_prelu_kernel(%arg0: i32, %arg1: memref<128x27xbf16, #tpu.memory_space<vmem>>, %arg2: memref<27x16xbf16, #tpu.memory_space<vmem>>, %arg3: memref<1x16xf32, #tpu.memory_space<vmem>>, %arg4: memref<1x16xf32, #tpu.memory_space<vmem>>, %arg5: memref<128x16xf32, #tpu.memory_space<vmem>>) attributes {dimension_semantics = [#tpu.dimension_semantics<parallel>], iteration_bounds = array<i64: 1>, scalar_prefetch = 0 : i64, scratch_operands = 0 : i64, tpu.core_type = #tpu.core_type<tc>, window_params = [{transform_indices = @transform_0, window_bounds = array<i64: 128, 27>}, {pipeline_mode = #tpu.pipeline_mode<synchronous>, transform_indices = @transform_1, window_bounds = array<i64: 27, 16>}, {pipeline_mode = #tpu.pipeline_mode<synchronous>, transform_indices = @transform_2, window_bounds = array<i64: 1, 16>}, {pipeline_mode = #tpu.pipeline_mode<synchronous>, transform_indices = @transform_3, window_bounds = array<i64: 1, 16>}, {transform_indices = @transform_4, window_bounds = array<i64: 128, 16>}]} {
    %c0 = arith.constant 0 : index
    %c0_0 = arith.constant 0 : index
    %0 = vector.load %arg1[%c0, %c0_0] : memref<128x27xbf16, #tpu.memory_space<vmem>>, vector<128x27xbf16>
    %c0_1 = arith.constant 0 : index
    %c0_2 = arith.constant 0 : index
    %1 = vector.load %arg2[%c0_1, %c0_2] : memref<27x16xbf16, #tpu.memory_space<vmem>>, vector<27x16xbf16>
    %cst = arith.constant dense<0.000000e+00> : vector<128x16xf32>
    %2 = tpu.matmul %0, %1, %cst {dimension_numbers = #tpu.dot_dimension_numbers<[1], [0], [0], [1], [0, 0, 1, 1], [], []>} : vector<128x27xbf16>, vector<27x16xbf16>, vector<128x16xf32> -> vector<128x16xf32>
    %c0_3 = arith.constant 0 : index
    %c0_4 = arith.constant 0 : index
    %3 = vector.load %arg3[%c0_3, %c0_4] : memref<1x16xf32, #tpu.memory_space<vmem>>, vector<1x16xf32>
    %4 = vector.broadcast %3 : vector<1x16xf32> to vector<128x16xf32>
    %5 = arith.addf %2, %4 : vector<128x16xf32>
    %cst_5 = arith.constant 0.000000e+00 : f32
    %6 = vector.broadcast %cst_5 : f32 to vector<128x16xf32>
    %7 = arith.cmpf oge, %5, %6 : vector<128x16xf32>
    %c0_6 = arith.constant 0 : index
    %c0_7 = arith.constant 0 : index
    %8 = vector.load %arg4[%c0_6, %c0_7] : memref<1x16xf32, #tpu.memory_space<vmem>>, vector<1x16xf32>
    %9 = vector.broadcast %8 : vector<1x16xf32> to vector<128x16xf32>
    %10 = arith.mulf %9, %5 : vector<128x16xf32>
    %11 = arith.select %7, %5, %10 : vector<128x16xi1>, vector<128x16xf32>
    %c0_8 = arith.constant 0 : index
    %c0_9 = arith.constant 0 : index
    %12 = vector.load %arg5[%c0_8, %c0_9] : memref<128x16xf32, #tpu.memory_space<vmem>>, vector<128x16xf32>
    tpu.vector_store %arg5[%c0_8, %c0_9], %11 {strides = array<i32>} : memref<128x16xf32, #tpu.memory_space<vmem>>, vector<128x16xf32>,
    return
  }
  func.func @transform_0(%arg0: i32) -> (i32, i32) {
    %c0_i32 = arith.constant 0 : i32
    %c0_i32_0 = arith.constant 0 : i32
    return %arg0, %c0_i32 : i32, i32
  }
  func.func @transform_1(%arg0: i32) -> (i32, i32) {
    %c0_i32 = arith.constant 0 : i32
    %c0_i32_0 = arith.constant 0 : i32
    %c0_i32_1 = arith.constant 0 : i32
    return %c0_i32, %c0_i32_0 : i32, i32
  }
  func.func @transform_2(%arg0: i32) -> (i32, i32) {
    %c0_i32 = arith.constant 0 : i32
    %c0_i32_0 = arith.constant 0 : i32
    %c0_i32_1 = arith.constant 0 : i32
    return %c0_i32, %c0_i32_0 : i32, i32
  }
  func.func @transform_3(%arg0: i32) -> (i32, i32) {
    %c0_i32 = arith.constant 0 : i32
    %c0_i32_0 = arith.constant 0 : i32
    %c0_i32_1 = arith.constant 0 : i32
    return %c0_i32, %c0_i32_0 : i32, i32
  }
  func.func @transform_4(%arg0: i32) -> (i32, i32) {
    %c0_i32 = arith.constant 0 : i32
    %c0_i32_0 = arith.constant 0 : i32
    return %arg0, %c0_i32 : i32, i32
  }
}

</mosaic_0001>

<bundles_post_ra>
// kernel: pallas_matmul_bias_prelu.1
= control target key start
LH: loop header
LB: loop body
LE: loop exit
PB: predicated region body
PF: predicated region fallthrough
CT: control target
= control target key end

     0   :  { %vm121_vm0 = vcmask 1044480   ;;  %vm122_vm1 = vcmask 1045504   ;;  %vm96_vm2 = vcmask 220160   ;;  %v366_v1 = vmov 65535   ;;  %s536_s1 = inlined_call_operand.vmem [shape: bf16[27,16], index: 1, kind: input, shape index: {}]   ;;  %s537_s0 = inlined_call_operand.vmem [shape: bf16[128,27], index: 0, kind: input, shape index: {}]   ;;  %s538_s2 = inlined_call_operand.vmem [shape: f32[1,16], index: 2, kind: input, shape index: {}]   ;;  %s539_s3 = inlined_call_operand.vmem [shape: f32[1,16], index: 3, kind: input, shape index: {}]   ;;  %s540_s4 = inlined_call_operand.vmem [shape: f32[128,16], index: 4, kind: output, shape index: {}]  }
   0x1   :  { %v356_v0 = vld [vmem:[%s536_s1] sm:$0xff]   ;;  %v123_v2 = vsel %vm121_vm0, 4294967295, %v366_v1  ;;  %v357_v3 = vld [vmem:[%s536_s1 + $0x8] sm:$0x3f]   ;;  %v362_v10 = vld [vmem:[%s537_s0 + $0x10] sm:$0xff]   ;;  %vm280_vm3 = vcmask 130048  }
   0x2   :  { %331 = vmatprep.subr.bf16.mxu0 %v356_v0  ;;  %351 = vmatprep.subr.bf16.mxu1 %v356_v0  ;;  %v124_v4 = vsel %vm122_vm1, %v123_v2, 0  ;;  %v358_v5 = vld [vmem:[%s537_s0] sm:$0xff]   ;;  %v360_v8 = vld [vmem:[%s537_s0 + $0x8] sm:$0xff]   ;;  %v363_v11 = vld [vmem:[%s537_s0 + $0x30] sm:$0xff]  }
   0x3   :  { %332 = vmatpush3.bf16.msra.mxu0 %v356_v0  ;;  %353 = vmatpush3.bf16.msra.mxu1 %v356_v0  ;;  %v126_v6 = vand.u32 %v357_v3, %v124_v4  ;;  %v359_v7 = vld [vmem:[%s537_s0 + $0x20] sm:$0xff]   ;;  %v361_v9 = vld [vmem:[%s537_s0 + $0x28] sm:$0xff]   ;;  %v364_v12 = vld [vmem:[%s537_s0 + $0x18] sm:$0xff]  }
   0x4   :  { %335 = vmatprep.mubr.msk.bf16.mxu0 %vm96_vm2, %v358_v5  ;;  %343 = vmatprep.mubr.msk.bf16.mxu1 %vm96_vm2, %v359_v7  ;;  %v365_v13 = vld [vmem:[%s537_s0 + $0x38] sm:$0xff]   ;;  %v433_v14 = vld [vmem:[%s538_s2] ss:$0 sm:$0xff] }
   0x5   :  { %333 = vmatprep.subr.bf16.mxu0 %v126_v6  ;;  %352 = vmatprep.subr.bf16.mxu1 %v126_v6  ;;  %v438_v16 = vld [vmem:[%s539_s3] ss:$0 sm:$0xff] }
   0x7   :  { %334 = vmatpush3.bf16.msra.mxu0 %v126_v6  ;;  %354 = vmatpush3.bf16.msra.mxu1 %v126_v6 }
   0xa   :  { %336 = vmatmul.mubr.msk.bf16.vlgmr.msra.gmra.mrb[0].mxu0 %vm96_vm2, %v360_v8  ;;  %344 = vmatmul.mubr.msk.bf16.vlgmr.msra.gmra.mrb[0].mxu1 %vm96_vm2, %v361_v9 }
   0xb   :  { %339 = vmatprep.mubr.msk.bf16.mxu0 %vm96_vm2, %v362_v10  ;;  %347 = vmatprep.mubr.msk.bf16.mxu1 %vm96_vm2, %v363_v11 }
  0x12   :  { %340 = vmatmul.mubr.msk.bf16.gmra.mrb[4].mxu0 %vm96_vm2, %v364_v12  ;;  %348 = vmatmul.mubr.msk.bf16.gmra.mrb[4].mxu1 %vm96_vm2, %v365_v13 }
  0xdd   :  { %v337_v15 = vpop.f32.mrb[0].mxu0  ;;  %v345_v17 = vpop.f32.mrb[0].mxu1 }
  0xde   :  { %v171_v18 = vadd.f32 %v337_v15, %v433_v14  ;;  %v203_v19 = vadd.f32 %v345_v17, %v433_v14  ;;  %v162_v20 = vpop.f32.mrb[1].mxu0  ;;  %v194_v21 = vpop.f32.mrb[1].mxu1 }
  0xdf   :  { %v163_v22 = vadd.f32 %v433_v14, %v162_v20  ;;  %v195_v23 = vadd.f32 %v433_v14, %v194_v21  ;;  %v338_v24 = vpop.f32.mrb[2].mxu0  ;;  %v346_v25 = vpop.f32.mrb[2].mxu1 }
  0xe0   :  { %vm227_vm4 = vcmp.ge.f32.partialorder %v171_v18, 0.0  ;;  %v250_v26 = vmul.f32 %v438_v16, %v171_v18  ;;  %vm235_vm5 = vcmp.ge.f32.partialorder %v203_v19, 0.0  ;;  %v258_v27 = vmul.f32 %v438_v16, %v203_v19  ;;  %v165_v28 = vpop.f32.mrb[3].mxu0  ;;  %v197_v29 = vpop.f32.mrb[3].mxu1 }
  0xe1   :  { %vm225_vm6 = vcmp.ge.f32.partialorder %v163_v22, 0.0  ;;  %v248_v30 = vmul.f32 %v438_v16, %v163_v22  ;;  %vm233_vm7 = vcmp.ge.f32.partialorder %v195_v23, 0.0  ;;  %v256_v31 = vmul.f32 %v438_v16, %v195_v23 }
  0xe2   :  { %v266_v32 = vsel %vm227_vm4, %v171_v18, %v250_v26  ;;  %v274_v33 = vsel %vm235_vm5, %v203_v19, %v258_v27  ;;  %v174_v34 = vadd.f32 %v338_v24, %v433_v14  ;;  %v206_v35 = vadd.f32 %v346_v25, %v433_v14 }
  0xe3   :  { %283 = vst.msk [vmem:[%s540_s4 + $0x10] sm:$0xff] %vm280_vm3, %v266_v32  ;;  %291 = vst.msk [vmem:[%s540_s4 + $0x50] sm:$0xff] %vm280_vm3, %v274_v33  ;;  %v264_v36 = vsel %vm225_vm6, %v163_v22, %v248_v30  ;;  %v272_v37 = vsel %vm233_vm7, %v195_v23, %v256_v31  ;;  %v166_v38 = vadd.f32 %v433_v14, %v165_v28 }
  0xe4   :  { %v198_v39 = vadd.f32 %v433_v14, %v197_v29  ;;  %281 = vst.msk [vmem:[%s540_s4] sm:$0xff] %vm280_vm3, %v264_v36  ;;  %289 = vst.msk [vmem:[%s540_s4 + $0x40] sm:$0xff] %vm280_vm3, %v272_v37  ;;  %vm228_vm8 = vcmp.ge.f32.partialorder %v174_v34, 0.0  ;;  %v251_v40 = vmul.f32 %v438_v16, %v174_v34  ;;  %vm236_vm9 = vcmp.ge.f32.partialorder %v206_v35, 0.0 }
  0xe5   :  { %v259_v41 = vmul.f32 %v438_v16, %v206_v35  ;;  %vm226_vm10 = vcmp.ge.f32.partialorder %v166_v38, 0.0  ;;  %v249_v42 = vmul.f32 %v438_v16, %v166_v38  ;;  %v341_v44 = vpop.f32.mrb[4].mxu0  ;;  %v349_v45 = vpop.f32.mrb[4].mxu1 }
  0xe6   :  { %vm234_vm11 = vcmp.ge.f32.partialorder %v198_v39, 0.0  ;;  %v257_v43 = vmul.f32 %v438_v16, %v198_v39  ;;  %v267_v46 = vsel %vm228_vm8, %v174_v34, %v251_v40  ;;  %v187_v48 = vadd.f32 %v341_v44, %v433_v14  ;;  %v178_v50 = vpop.f32.mrb[5].mxu0  ;;  %v210_v51 = vpop.f32.mrb[5].mxu1 }
  0xe7   :  { %v275_v47 = vsel %vm236_vm9, %v206_v35, %v259_v41  ;;  %v219_v49 = vadd.f32 %v349_v45, %v433_v14  ;;  %284 = vst.msk [vmem:[%s540_s4 + $0x18] sm:$0xff] %vm280_vm3, %v267_v46  ;;  %v265_v52 = vsel %vm226_vm10, %v166_v38, %v249_v42  ;;  %v179_v54 = vadd.f32 %v433_v14, %v178_v50  ;;  %v342_v56 = vpop.f32.mrb[6].mxu0  ;;  %v350_v57 = vpop.f32.mrb[6].mxu1 }
  0xe8   :  { %292 = vst.msk [vmem:[%s540_s4 + $0x58] sm:$0xff] %vm280_vm3, %v275_v47  ;;  %v273_v53 = vsel %vm234_vm11, %v198_v39, %v257_v43  ;;  %v211_v55 = vadd.f32 %v433_v14, %v210_v51  ;;  %282 = vst.msk [vmem:[%s540_s4 + $0x8] sm:$0xff] %vm280_vm3, %v265_v52  ;;  %vm231_vm12 = vcmp.ge.f32.partialorder %v187_v48, 0.0  ;;  %v254_v58 = vmul.f32 %v438_v16, %v187_v48  ;;  %v181_v60 = vpop.f32.mrb[7].mxu0  ;;  %v213_v61 = vpop.f32.mrb[7].mxu1 }
  0xe9   :  { %290 = vst.msk [vmem:[%s540_s4 + $0x48] sm:$0xff] %vm280_vm3, %v273_v53  ;;  %vm239_vm13 = vcmp.ge.f32.partialorder %v219_v49, 0.0  ;;  %v262_v59 = vmul.f32 %v438_v16, %v219_v49  ;;  %vm229_vm14 = vcmp.ge.f32.partialorder %v179_v54, 0.0  ;;  %v252_v62 = vmul.f32 %v438_v16, %v179_v54 }
  0xea   :  { %vm237_vm15 = vcmp.ge.f32.partialorder %v211_v55, 0.0  ;;  %v260_v63 = vmul.f32 %v438_v16, %v211_v55  ;;  %v270_v0 = vsel %vm231_vm12, %v187_v48, %v254_v58  ;;  %v190_v2 = vadd.f32 %v342_v56, %v433_v14 }
  0xeb   :  { %v278_v1 = vsel %vm239_vm13, %v219_v49, %v262_v59  ;;  %v222_v3 = vadd.f32 %v350_v57, %v433_v14  ;;  %287 = vst.msk [vmem:[%s540_s4 + $0x30] sm:$0xff] %vm280_vm3, %v270_v0  ;;  %v268_v4 = vsel %vm229_vm14, %v179_v54, %v252_v62  ;;  %v182_v6 = vadd.f32 %v433_v14, %v181_v60 }
  0xec   :  { %295 = vst.msk [vmem:[%s540_s4 + $0x70] sm:$0xff] %vm280_vm3, %v278_v1  ;;  %v276_v5 = vsel %vm237_vm15, %v211_v55, %v260_v63  ;;  %v214_v7 = vadd.f32 %v433_v14, %v213_v61  ;;  %285 = vst.msk [vmem:[%s540_s4 + $0x20] sm:$0xff] %vm280_vm3, %v268_v4  ;;  %vm232_vm0 = vcmp.ge.f32.partialorder %v190_v2, 0.0  ;;  %v255_v8 = vmul.f32 %v438_v16, %v190_v2 }
  0xed   :  { %293 = vst.msk [vmem:[%s540_s4 + $0x60] sm:$0xff] %vm280_vm3, %v276_v5  ;;  %vm240_vm1 = vcmp.ge.f32.partialorder %v222_v3, 0.0  ;;  %v263_v9 = vmul.f32 %v438_v16, %v222_v3  ;;  %vm230_vm2 = vcmp.ge.f32.partialorder %v182_v6, 0.0  ;;  %v253_v10 = vmul.f32 %v438_v16, %v182_v6 }
  0xee   :  { %vm238_vm4 = vcmp.ge.f32.partialorder %v214_v7, 0.0  ;;  %v261_v11 = vmul.f32 %v438_v16, %v214_v7  ;;  %v271_v12 = vsel %vm232_vm0, %v190_v2, %v255_v8 }
  0xef   :  { %v279_v13 = vsel %vm240_vm1, %v222_v3, %v263_v9  ;;  %288 = vst.msk [vmem:[%s540_s4 + $0x38] sm:$0xff] %vm280_vm3, %v271_v12  ;;  %v269_v14 = vsel %vm230_vm2, %v182_v6, %v253_v10 }
  0xf0   :  { %296 = vst.msk [vmem:[%s540_s4 + $0x78] sm:$0xff] %vm280_vm3, %v279_v13  ;;  %v277_v15 = vsel %vm238_vm4, %v214_v7, %v261_v11  ;;  %286 = vst.msk [vmem:[%s540_s4 + $0x28] sm:$0xff] %vm280_vm3, %v269_v14 }
  0xf1   :  { %294 = vst.msk [vmem:[%s540_s4 + $0x68] sm:$0xff] %vm280_vm3, %v277_v15 }

</bundles_post_ra>
